<compile_context>
chip_gen: v5e
topology: v5e:2x2
jax: 0.10.0
libtpu: 0.0.40
codegen_flags: <defaults>
</compile_context>

<pallas_src>
import functools

import jax
import jax.numpy as jnp
import numpy as np
from jax.experimental import pallas as pl
from jax.experimental.pallas import tpu as pltpu

_HIGHEST = jax.lax.Precision.HIGHEST
_ROW_TILE_CAP = 8192  # rows/cols per grid step; ~1.8 MB of HBM traffic at Np=16, D=8


# ----------------------------------------------------------------------------
# Tile selection
# ----------------------------------------------------------------------------
def _round_up(x, m):
    return ((x + m - 1) // m) * m


def _pick_tile_n(N):
    """Row tile for the module-layout kernels (multiple of 8 sublanes).

    Largest tile that keeps >= 2 grid steps (>= 4 when tiles stay >= 512 rows),
    capped at 8192 rows.  >= 2 "parallel" steps keeps both v7x TensorCores fed;
    large tiles amortize the ~0.35 us per-step pipeline overhead; VMEM stays
    tiny on every generation."""
    if N <= 16:
        return max(8, _round_up(N, 8))
    tn4 = _round_up(pl.cdiv(N, 4), 8)
    if tn4 >= 512:
        return min(tn4, _ROW_TILE_CAP)
    return min(_round_up(pl.cdiv(N, 2), 8), _ROW_TILE_CAP)


def _pick_tile_n_lanes(N):
    """Column tile for the lane-dense (transposed) variants: multiple of 128
    lanes (or the full N when N <= 128)."""
    if N <= 128:
        return N
    tn4 = _round_up(pl.cdiv(N, 4), 128)
    if tn4 >= 512:
        return min(tn4, _ROW_TILE_CAP)
    return min(_round_up(pl.cdiv(N, 2), 128), _ROW_TILE_CAP)


def _validate_tile(tile_n, N, multiple):
    """Guard user-supplied tiles: round up to the hardware multiple (8 sublanes
    or 128 lanes) and cap at padded N so an odd tile never violates the
    (8,128) rule."""
    if tile_n == N:
        return tile_n
    tn = max(multiple, _round_up(int(tile_n), multiple))
    return min(tn, _round_up(N, multiple))


# ----------------------------------------------------------------------------
# Kernel compute bodies (all math in f32; loads up-cast, stores down-cast)
# ----------------------------------------------------------------------------
def _rbf_compute(x_ref, vsT_ref, c_ref, zat_ref, inv_l_ref, lv_ref):
    """Module layout: X tile (TN,D), outputs (TN,Np)."""
    lv = lv_ref[0, 0]
    xs = x_ref[...].astype(jnp.float32) * inv_l_ref[...]            # (TN, D)
    x2 = jnp.sum(xs * xs, axis=1, keepdims=True)                    # (TN, 1)
    cross = jnp.dot(xs, vsT_ref[...],
                    preferred_element_type=jnp.float32,
                    precision=_HIGHEST)                              # (TN, Np) MXU
    # var*exp(-0.5*max(r2,0)) == exp(min(cross - 0.5*x2 + c, logvar)),
    # c = logvar - 0.5*||v/l||^2 precomputed in the wrapper.  The clamp also
    # bounds exp() on padded rows of the last partial tile.
    arg = jnp.minimum(cross - 0.5 * x2 + c_ref[...], lv)
    k = jnp.exp(arg)                                                 # EUP
    m = k * (zat_ref[...].astype(jnp.float32) - 0.5 * k)             # fused ELBO
    return m, k


def _rbf_t_compute(xT_ref, vs_ref, c_ref, zatT_ref, inv_lT_ref, lv_ref):
    """Lane-dense layout: X^T tile (D,TN), outputs (Np,TN)."""
    lv = lv_ref[0, 0]
    xs = xT_ref[...].astype(jnp.float32) * inv_lT_ref[...]          # (D, TN)
    x2 = jnp.sum(xs * xs, axis=0, keepdims=True)                    # (1, TN)
    cross = jnp.dot(vs_ref[...], xs,
                    preferred_element_type=jnp.float32,
                    precision=_HIGHEST)                              # (Np, TN) MXU
    arg = jnp.minimum(cross - 0.5 * x2 + c_ref[...], lv)
    k = jnp.exp(arg)
    m = k * (zatT_ref[...].astype(jnp.float32) - 0.5 * k)
    return m, k


def _linear_compute(x_ref, vsT_ref, zat_ref, rv_ref):
    xs = x_ref[...].astype(jnp.float32) * rv_ref[...]                # (TN, D)
    k = jnp.dot(xs, vsT_ref[...],
                preferred_element_type=jnp.float32,
                precision=_HIGHEST)                                  # (TN, Np)
    m = k * (zat_ref[...].astype(jnp.float32) - 0.5 * k)
    return m, k


def _linear_t_compute(xT_ref, vs_ref, zatT_ref, rvT_ref):
    xs = xT_ref[...].astype(jnp.float32) * rvT_ref[...]              # (D, TN)
    k = jnp.dot(vs_ref[...], xs,
                preferred_element_type=jnp.float32,
                precision=_HIGHEST)                                  # (Np, TN)
    m = k * (zatT_ref[...].astype(jnp.float32) - 0.5 * k)
    return m, k


# ----------------------------------------------------------------------------
# Kernel entry points (M+K and M-only variants)
# ----------------------------------------------------------------------------
def _rbf_kernel_mk(x_ref, vsT_ref, c_ref, zat_ref, inv_l_ref, lv_ref,
                   m_ref, k_ref):
    m, k = _rbf_compute(x_ref, vsT_ref, c_ref, zat_ref, inv_l_ref, lv_ref)
    m_ref[...] = m.astype(m_ref.dtype)
    k_ref[...] = k.astype(k_ref.dtype)


def _rbf_kernel_m(x_ref, vsT_ref, c_ref, zat_ref, inv_l_ref, lv_ref, m_ref):
    m, _ = _rbf_compute(x_ref, vsT_ref, c_ref, zat_ref, inv_l_ref, lv_ref)
    m_ref[...] = m.astype(m_ref.dtype)


def _rbf_t_kernel_mk(xT_ref, vs_ref, c_ref, zatT_ref, inv_lT_ref, lv_ref,
                     m_ref, k_ref):
    m, k = _rbf_t_compute(xT_ref, vs_ref, c_ref, zatT_ref, inv_lT_ref, lv_ref)
    m_ref[...] = m.astype(m_ref.dtype)
    k_ref[...] = k.astype(k_ref.dtype)


def _rbf_t_kernel_m(xT_ref, vs_ref, c_ref, zatT_ref, inv_lT_ref, lv_ref, m_ref):
    m, _ = _rbf_t_compute(xT_ref, vs_ref, c_ref, zatT_ref, inv_lT_ref, lv_ref)
    m_ref[...] = m.astype(m_ref.dtype)


def _linear_kernel_mk(x_ref, vsT_ref, zat_ref, rv_ref, m_ref, k_ref):
    m, k = _linear_compute(x_ref, vsT_ref, zat_ref, rv_ref)
    m_ref[...] = m.astype(m_ref.dtype)
    k_ref[...] = k.astype(k_ref.dtype)


def _linear_kernel_m(x_ref, vsT_ref, zat_ref, rv_ref, m_ref):
    m, _ = _linear_compute(x_ref, vsT_ref, zat_ref, rv_ref)
    m_ref[...] = m.astype(m_ref.dtype)


def _linear_t_kernel_mk(xT_ref, vs_ref, zatT_ref, rvT_ref, m_ref, k_ref):
    m, k = _linear_t_compute(xT_ref, vs_ref, zatT_ref, rvT_ref)
    m_ref[...] = m.astype(m_ref.dtype)
    k_ref[...] = k.astype(k_ref.dtype)


def _linear_t_kernel_m(xT_ref, vs_ref, zatT_ref, rvT_ref, m_ref):
    m, _ = _linear_t_compute(xT_ref, vs_ref, zatT_ref, rvT_ref)
    m_ref[...] = m.astype(m_ref.dtype)


_KERNELS = {
    ("rbf", False, True): _rbf_kernel_mk,
    ("rbf", False, False): _rbf_kernel_m,
    ("rbf", True, True): _rbf_t_kernel_mk,
    ("rbf", True, False): _rbf_t_kernel_m,
    ("linear", False, True): _linear_kernel_mk,
    ("linear", False, False): _linear_kernel_m,
    ("linear", True, True): _linear_t_kernel_mk,
    ("linear", True, False): _linear_t_kernel_m,
}


# ----------------------------------------------------------------------------
# pallas_call builder
# ----------------------------------------------------------------------------
def _build_call(kind, N, Np, D, TN, want_k, out_dtype, transposed):
    grid = (pl.cdiv(N, TN),)
    const = lambda i: (0, 0)

    if not transposed:
        tile_map = lambda i: (i, 0)                                  # rows tiled
        x_spec = pl.BlockSpec((TN, D), tile_map)
        zat_spec = pl.BlockSpec((TN, Np), tile_map)
        v_spec = pl.BlockSpec((D, Np), const)                        # resident
        scale_spec = pl.BlockSpec((1, D), const)
        c_spec = pl.BlockSpec((1, Np), const)
        out_block, out_full = (TN, Np), (N, Np)
    else:
        tile_map = lambda i: (0, i)                                  # lanes tiled
        x_spec = pl.BlockSpec((D, TN), tile_map)
        zat_spec = pl.BlockSpec((Np, TN), tile_map)
        v_spec = pl.BlockSpec((Np, D), const)                        # resident
        scale_spec = pl.BlockSpec((D, 1), const)
        c_spec = pl.BlockSpec((Np, 1), const)
        out_block, out_full = (Np, TN), (Np, N)

    m_spec = pl.BlockSpec(out_block, tile_map)
    m_shape = jax.ShapeDtypeStruct(out_full, out_dtype)
    if want_k:
        out_specs = (m_spec, pl.BlockSpec(out_block, tile_map))
        out_shape = (m_shape, jax.ShapeDtypeStruct(out_full, out_dtype))
    else:
        out_specs, out_shape = m_spec, m_shape

    if kind == "rbf":
        in_specs = [x_spec, v_spec, c_spec, zat_spec, scale_spec,
                    pl.BlockSpec(memory_space=pltpu.MemorySpace.SMEM)]  # logvar
    else:
        in_specs = [x_spec, v_spec, zat_spec, scale_spec]

    return pl.pallas_call(
        _KERNELS[(kind, transposed, want_k)],
        out_shape=out_shape,
        grid_spec=pltpu.PrefetchScalarGridSpec(
            num_scalar_prefetch=0,
            grid=grid,
            in_specs=in_specs,
            out_specs=out_specs,
        ),
        compiler_params=pltpu.CompilerParams(
            dimension_semantics=("parallel",)),
    )


# ----------------------------------------------------------------------------
# Public wrappers — module-fidelity (N, Np) layout
# ----------------------------------------------------------------------------
@functools.partial(jax.jit, static_argnames=("tile_n", "want_k", "out_dtype"))
def sparse_elbo_rbf(X, V, ZAT, lengthscale, variance, *, tile_n=None,
                    want_k=True, out_dtype=jnp.float32):
    """K = var*exp(-0.5*||(x-v)/l||^2);  M = K*ZAT - 0.5*K^2.
    Returns (M, K) when want_k else just M (skips the K HBM writeback)."""
    N, D = X.shape
    Np = V.shape[0]
    TN = _pick_tile_n(N) if tile_n is None else _validate_tile(tile_n, N, 8)

    inv_l = (1.0 / lengthscale.astype(jnp.float32)).reshape(1, D)
    vs = V.astype(jnp.float32) * inv_l                               # (Np, D)
    vsT = vs.T                                                       # (D, Np)
    logvar = jnp.log(jnp.asarray(variance, jnp.float32)).reshape(1, 1)
    c = logvar - 0.5 * jnp.sum(vs * vs, axis=1).reshape(1, Np)       # (1, Np)

    call = _build_call("rbf", N, Np, D, TN, want_k, out_dtype, transposed=False)
    outs = call(X, vsT, c, ZAT, inv_l, logvar)
    return (outs[0], outs[1]) if want_k else outs


@functools.partial(jax.jit, static_argnames=("tile_n", "want_k", "out_dtype"))
def sparse_elbo_linear(X, V, ZAT, log_variance, *, tile_n=None, want_k=True,
                       out_dtype=jnp.float32):
    """rv = sqrt(exp(log_var));  K = (X*rv)@(V*rv).T;  M = K*ZAT - 0.5*K^2."""
    N, D = X.shape
    Np = V.shape[0]
    TN = _pick_tile_n(N) if tile_n is None else _validate_tile(tile_n, N, 8)

    rv = jnp.sqrt(jnp.exp(log_variance.astype(jnp.float32))).reshape(1, D)
    vsT = (V.astype(jnp.float32) * rv).T                             # (D, Np)

    call = _build_call("linear", N, Np, D, TN, want_k, out_dtype, transposed=False)
    outs = call(X, vsT, ZAT, rv)
    return (outs[0], outs[1]) if want_k else outs


# ----------------------------------------------------------------------------
# Public wrappers — lane-dense transposed layout (opt-in)
#   Inputs X^T (D,N), ZAT^T (Np,N); outputs M^T [, K^T] of shape (Np, N).
# ----------------------------------------------------------------------------
@functools.partial(jax.jit, static_argnames=("tile_n", "want_k", "out_dtype"))
def sparse_elbo_rbf_lane_dense(XT, V, ZATT, lengthscale, variance, *,
                               tile_n=None, want_k=True, out_dtype=jnp.float32):
    D, N = XT.shape
    Np = V.shape[0]
    TN = (_pick_tile_n_lanes(N) if tile_n is None
          else _validate_tile(tile_n, N, 128))

    inv_l_row = (1.0 / lengthscale.astype(jnp.float32)).reshape(1, D)
    vs = V.astype(jnp.float32) * inv_l_row                           # (Np, D)
    logvar = jnp.log(jnp.asarray(variance, jnp.float32)).reshape(1, 1)
    c = logvar - 0.5 * jnp.sum(vs * vs, axis=1, keepdims=True)       # (Np, 1)
    inv_lT = inv_l_row.T                                             # (D, 1)

    call = _build_call("rbf", N, Np, D, TN, want_k, out_dtype, transposed=True)
    outs = call(XT, vs, c, ZATT, inv_lT, logvar)
    return (outs[0], outs[1]) if want_k else outs


@functools.partial(jax.jit, static_argnames=("tile_n", "want_k", "out_dtype"))
def sparse_elbo_linear_lane_dense(XT, V, ZATT, log_variance, *, tile_n=None,
                                  want_k=True, out_dtype=jnp.float32):
    D, N = XT.shape
    Np = V.shape[0]
    TN = (_pick_tile_n_lanes(N) if tile_n is None
          else _validate_tile(tile_n, N, 128))

    rv = jnp.sqrt(jnp.exp(log_variance.astype(jnp.float32))).reshape(1, D)
    vs = V.astype(jnp.float32) * rv                                  # (Np, D)

    call = _build_call("linear", N, Np, D, TN, want_k, out_dtype, transposed=True)
    outs = call(XT, vs, ZATT, rv.T)
    return (outs[0], outs[1]) if want_k else outs


# ----------------------------------------------------------------------------
# Pure-JAX references (for correctness check) — precision=HIGHEST to match
# ----------------------------------------------------------------------------
def _ref_rbf(X, V, ZAT, lengthscale, variance):
    xs = X / lengthscale
    vs = V / lengthscale
    r2 = (jnp.sum(xs * xs, 1, keepdims=True)
          + jnp.sum(vs * vs, 1, keepdims=True).T
          - 2.0 * jnp.dot(xs, vs.T, precision=_HIGHEST))
    K = variance * jnp.exp(-0.5 * jnp.maximum(r2, 0.0))
    return K * ZAT - 0.5 * K ** 2, K


def _ref_linear(X, V, ZAT, log_variance):
    rv = jnp.sqrt(jnp.exp(log_variance))
    K = jnp.dot(X * rv, (V * rv).T, precision=_HIGHEST)
    return K * ZAT - 0.5 * K ** 2, K


if __name__ == "__main__":
    # Small shapes consistent with the module: N data points, Np support
    # vectors (Np << N), D features.  N is not a tile multiple on purpose
    # (exercises the masked last tile).
    N, Np, D = 200, 16, 8
    key = jax.random.PRNGKey(0)
    kx, kv, kz = jax.random.split(key, 3)
    X = jax.random.normal(kx, (N, D), dtype=jnp.float32)
    V = jax.random.normal(kv, (Np, D), dtype=jnp.float32)
    ZAT = jax.random.normal(kz, (N, Np), dtype=jnp.float32)

    # Deterministic parameter init (fs=True branch of __init__):
    #   rbf    : variance = 1.0, lengthscale = 100 * ones(D)
    #   linear : log_variance = 1.0 * ones(D)
    lengthscale = 100.0 * jnp.ones((D,), jnp.float32)
    variance = jnp.float32(1.0)
    log_variance = jnp.ones((D,), jnp.float32)

    M_ref, K_ref = _ref_rbf(X, V, ZAT, lengthscale, variance)
    Ml_ref, Kl_ref = _ref_linear(X, V, ZAT, log_variance)

    # --- RBF, module layout, M + K ---
    M, K = sparse_elbo_rbf(X, V, ZAT, lengthscale, variance)
    jax.block_until_ready((M, K))
    np.testing.assert_allclose(np.asarray(M), np.asarray(M_ref), rtol=1e-5, atol=1e-5)
    np.testing.assert_allclose(np.asarray(K), np.asarray(K_ref), rtol=1e-5, atol=1e-5)

    # --- RBF, module layout, M only (skips K writeback) ---
    M_only = sparse_elbo_rbf(X, V, ZAT, lengthscale, variance, want_k=False)
    jax.block_until_ready(M_only)
    np.testing.assert_allclose(np.asarray(M_only), np.asarray(M_ref), rtol=1e-5, atol=1e-5)

    # --- Linear, module layout ---
    Ml, Kl = sparse_elbo_linear(X, V, ZAT, log_variance)
    jax.block_until_ready((Ml, Kl))
    np.testing.assert_allclose(np.asarray(Ml), np.asarray(Ml_ref), rtol=1e-5, atol=1e-5)
    np.testing.assert_allclose(np.asarray(Kl), np.asarray(Kl_ref), rtol=1e-5, atol=1e-5)

    Ml_only = sparse_elbo_linear(X, V, ZAT, log_variance, want_k=False)
    jax.block_until_ready(Ml_only)
    np.testing.assert_allclose(np.asarray(Ml_only), np.asarray(Ml_ref), rtol=1e-5, atol=1e-5)

    # --- Lane-dense transposed variants (caller supplies/consumes (D,N)/(Np,N)) ---
    XT, ZATT = X.T, ZAT.T
    MT, KT = sparse_elbo_rbf_lane_dense(XT, V, ZATT, lengthscale, variance)
    jax.block_until_ready((MT, KT))
    np.testing.assert_allclose(np.asarray(MT), np.asarray(M_ref.T), rtol=1e-5, atol=1e-5)
    np.testing.assert_allclose(np.asarray(KT), np.asarray(K_ref.T), rtol=1e-5, atol=1e-5)

    MlT, KlT = sparse_elbo_linear_lane_dense(XT, V, ZATT, log_variance)
    jax.block_until_ready((MlT, KlT))
    np.testing.assert_allclose(np.asarray(MlT), np.asarray(Ml_ref.T), rtol=1e-5, atol=1e-5)
    np.testing.assert_allclose(np.asarray(KlT), np.asarray(Kl_ref.T), rtol=1e-5, atol=1e-5)

    print("KERNEL_OK")
</pallas_src>

<mosaic_0001>
module attributes {stable_mosaic.version = 11 : i64} {
  func.func @_rbf_kernel_mk(%arg0: i32, %arg1: memref<104x8xf32, #tpu.memory_space<vmem>>, %arg2: memref<8x16xf32, #tpu.memory_space<vmem>>, %arg3: memref<1x16xf32, #tpu.memory_space<vmem>>, %arg4: memref<104x16xf32, #tpu.memory_space<vmem>>, %arg5: memref<1x8xf32, #tpu.memory_space<vmem>>, %arg6: memref<1x1xf32, #tpu.memory_space<smem>>, %arg7: memref<104x16xf32, #tpu.memory_space<vmem>>, %arg8: memref<104x16xf32, #tpu.memory_space<vmem>>) attributes {dimension_semantics = [#tpu.dimension_semantics<parallel>], iteration_bounds = array<i64: 2>, scalar_prefetch = 0 : i64, scratch_operands = 0 : i64, tpu.core_type = #tpu.core_type<tc>, window_params = [{transform_indices = @transform_0, window_bounds = array<i64: 104, 8>}, {pipeline_mode = #tpu.pipeline_mode<synchronous>, transform_indices = @transform_1, window_bounds = array<i64: 8, 16>}, {pipeline_mode = #tpu.pipeline_mode<synchronous>, transform_indices = @transform_2, window_bounds = array<i64: 1, 16>}, {transform_indices = @transform_3, window_bounds = array<i64: 104, 16>}, {pipeline_mode = #tpu.pipeline_mode<synchronous>, transform_indices = @transform_4, window_bounds = array<i64: 1, 8>}, {transform_indices = @transform_5, window_bounds = array<i64: 1, 1>}, {transform_indices = @transform_6, window_bounds = array<i64: 104, 16>}, {transform_indices = @transform_7, window_bounds = array<i64: 104, 16>}]} {
    %c0 = arith.constant 0 : index
    %c0_0 = arith.constant 0 : index
    %0 = memref.load %arg6[%c0, %c0_0] : memref<1x1xf32, #tpu.memory_space<smem>>
    %c0_1 = arith.constant 0 : index
    %c0_2 = arith.constant 0 : index
    %1 = vector.load %arg1[%c0_1, %c0_2] : memref<104x8xf32, #tpu.memory_space<vmem>>, vector<104x8xf32>
    %c0_3 = arith.constant 0 : index
    %c0_4 = arith.constant 0 : index
    %2 = vector.load %arg5[%c0_3, %c0_4] : memref<1x8xf32, #tpu.memory_space<vmem>>, vector<1x8xf32>
    %3 = vector.broadcast %2 : vector<1x8xf32> to vector<104x8xf32>
    %4 = arith.mulf %1, %3 : vector<104x8xf32>
    %5 = arith.mulf %4, %4 : vector<104x8xf32>
    %cst = arith.constant dense<0.000000e+00> : vector<104xf32>
    %6 = vector.multi_reduction <add>, %5, %cst [1] : vector<104x8xf32> to vector<104xf32>
    %7 = vector.shape_cast %6 : vector<104xf32> to vector<104x1xf32>
    %c0_5 = arith.constant 0 : index
    %c0_6 = arith.constant 0 : index
    %8 = vector.load %arg2[%c0_5, %c0_6] : memref<8x16xf32, #tpu.memory_space<vmem>>, vector<8x16xf32>
    %cst_7 = arith.constant dense<0.000000e+00> : vector<104x16xf32>
    %9 = tpu.matmul %4, %8, %cst_7 {dimension_numbers = #tpu.dot_dimension_numbers<[1], [0], [0], [1], [0, 0, 1, 1], [], []>, precision = #tpu.contract_precision<fp32>} : vector<104x8xf32>, vector<8x16xf32>, vector<104x16xf32> -> vector<104x16xf32>
    %cst_8 = arith.constant 5.000000e-01 : f32
    %10 = vector.broadcast %cst_8 : f32 to vector<104x1xf32>
    %11 = arith.mulf %10, %7 : vector<104x1xf32>
    %12 = vector.broadcast %11 : vector<104x1xf32> to vector<104x16xf32>
    %13 = arith.subf %9, %12 : vector<104x16xf32>
    %c0_9 = arith.constant 0 : index
    %c0_10 = arith.constant 0 : index
    %14 = vector.load %arg3[%c0_9, %c0_10] : memref<1x16xf32, #tpu.memory_space<vmem>>, vector<1x16xf32>
    %15 = vector.broadcast %14 : vector<1x16xf32> to vector<104x16xf32>
    %16 = arith.addf %13, %15 : vector<104x16xf32>
    %17 = vector.broadcast %0 : f32 to vector<104x16xf32>
    %18 = arith.minimumf %16, %17 : vector<104x16xf32>
    %19 = math.exp %18 : vector<104x16xf32>
    %c0_11 = arith.constant 0 : index
    %c0_12 = arith.constant 0 : index
    %20 = vector.load %arg4[%c0_11, %c0_12] : memref<104x16xf32, #tpu.memory_space<vmem>>, vector<104x16xf32>
    %cst_13 = arith.constant 5.000000e-01 : f32
    %21 = vector.broadcast %cst_13 : f32 to vector<104x16xf32>
    %22 = arith.mulf %21, %19 : vector<104x16xf32>
    %23 = arith.subf %20, %22 : vector<104x16xf32>
    %24 = arith.mulf %19, %23 : vector<104x16xf32>
    %c0_14 = arith.constant 0 : index
    %c0_15 = arith.constant 0 : index
    %25 = vector.load %arg7[%c0_14, %c0_15] : memref<104x16xf32, #tpu.memory_space<vmem>>, vector<104x16xf32>
    tpu.vector_store %arg7[%c0_14, %c0_15], %24 {strides = array<i32>} : memref<104x16xf32, #tpu.memory_space<vmem>>, vector<104x16xf32>,
    %c0_16 = arith.constant 0 : index
    %c0_17 = arith.constant 0 : index
    %26 = vector.load %arg8[%c0_16, %c0_17] : memref<104x16xf32, #tpu.memory_space<vmem>>, vector<104x16xf32>
    tpu.vector_store %arg8[%c0_16, %c0_17], %19 {strides = array<i32>} : memref<104x16xf32, #tpu.memory_space<vmem>>, vector<104x16xf32>,
    return
  }
  func.func @transform_0(%arg0: i32) -> (i32, i32) {
    %c0_i32 = arith.constant 0 : i32
    %c0_i32_0 = arith.constant 0 : i32
    return %arg0, %c0_i32 : i32, i32
  }
  func.func @transform_1(%arg0: i32) -> (i32, i32) {
    %c0_i32 = arith.constant 0 : i32
    %c0_i32_0 = arith.constant 0 : i32
    %c0_i32_1 = arith.constant 0 : i32
    return %c0_i32, %c0_i32_0 : i32, i32
  }
  func.func @transform_2(%arg0: i32) -> (i32, i32) {
    %c0_i32 = arith.constant 0 : i32
    %c0_i32_0 = arith.constant 0 : i32
    %c0_i32_1 = arith.constant 0 : i32
    return %c0_i32, %c0_i32_0 : i32, i32
  }
  func.func @transform_3(%arg0: i32) -> (i32, i32) {
    %c0_i32 = arith.constant 0 : i32
    %c0_i32_0 = arith.constant 0 : i32
    return %arg0, %c0_i32 : i32, i32
  }
  func.func @transform_4(%arg0: i32) -> (i32, i32) {
    %c0_i32 = arith.constant 0 : i32
    %c0_i32_0 = arith.constant 0 : i32
    %c0_i32_1 = arith.constant 0 : i32
    return %c0_i32, %c0_i32_0 : i32, i32
  }
  func.func @transform_5(%arg0: i32) -> (i32, i32) {
    %c0_i32 = arith.constant 0 : i32
    %c0_i32_0 = arith.constant 0 : i32
    %c0_i32_1 = arith.constant 0 : i32
    return %c0_i32, %c0_i32_0 : i32, i32
  }
  func.func @transform_6(%arg0: i32) -> (i32, i32) {
    %c0_i32 = arith.constant 0 : i32
    %c0_i32_0 = arith.constant 0 : i32
    return %arg0, %c0_i32 : i32, i32
  }
  func.func @transform_7(%arg0: i32) -> (i32, i32) {
    %c0_i32 = arith.constant 0 : i32
    %c0_i32_0 = arith.constant 0 : i32
    return %arg0, %c0_i32 : i32, i32
  }
}

</mosaic_0001>

<bundles_post_ra>
// kernel: sparse_elbo_rbf.1
= control target key start
LH: loop header
LB: loop body
LE: loop exit
PB: predicated region body
PF: predicated region fallthrough
CT: control target
= control target key end

     0   :  { %s2788_s0 = inlined_call_operand.vmem [shape: f32[200,8], index: 0, kind: input, shape index: {}]   ;;  %s2789_s1 = inlined_call_operand.vmem [shape: f32[8,16], index: 1, kind: input, shape index: {}]   ;;  %s2790_s2 = inlined_call_operand.vmem [shape: f32[1,16], index: 2, kind: input, shape index: {}]   ;;  %s2791_s3 = inlined_call_operand.vmem [shape: f32[200,16], index: 3, kind: input, shape index: {}]   ;;  %s2792_s4 = inlined_call_operand.vmem [shape: f32[1,8], index: 4, kind: input, shape index: {}]   ;;  %s2793_s5 = inlined_call_operand.<no memory space> [shape: f32[1,1], index: 5, kind: input, shape index: {}]   ;;  %s2794_s6 = inlined_call_operand.vmem [shape: f32[200,16], index: 6, kind: output, shape index: {0}]   ;;  %s2795_s7 = inlined_call_operand.vmem [shape: f32[200,16], index: 7, kind: output, shape index: {1}]  }
   0x1   :  { %13 = sst [smem:[#allocation2]] %s2793_s5 }
   0x2   :  { %s2102_s26 = smov 0   ;;  %s2104_s27 = smov 0  }
   0x3   :  { %s2106_s28 = smov 0  }
   0x4 LB: > { %s2115_s5 = sadd.s32 4294967295, %s1993_s28   ;;  %s2117_s29 = sadd.s32 1, %s1993_s28   ;;  %s1993_s28 = sphi %s2106_s28, %s2809_s28   ;;  %s1989_s27 = sphi %s2104_s27, %s2808_s27   ;;  %s1985_s26 = sphi %s2102_s26, %s2807_s26  }
   0x5   : > { %s159_s30 = ssub.s32 %s1993_s28, %s2117_s29  ;;  %s162_s8 = sadd.s32 1, %s1989_s27 }
   0x6   : > { %p160_p0 = scmp.eq.s32.totalorder %s159_s30, 0  ;;  %p172_p1 = scmp.ne.s32.totalorder %s1989_s27, %s1985_s26 }
   0x7   : > { %p173_p2 = scmp.eq.s32.totalorder %s2115_s5, 1  ;;  %p1683_p3 = scmp.ge.s32.totalorder %s1993_s28, 1 }
   0x8   : > { %s2125_s9 = scalar_select %p160_p0, %s1989_s27, %s162_s8  }
   0x9   : > { %p2127_p4 = por %p173_p2, %p172_p1  ;;  %p269_p5 = scmp.lt.s32.totalorder %s1993_s28, 3 }
   0xb   : > { %p270_p6 = pnand %p1683_p3, %p269_p5 }
   0xc   : > { %s2135_s13 = smul.u32 (!%p270_p6), 13, %s2115_s5  ;;  %s355_s21 = sld [smem:[#allocation2]] (!%p270_p6) }
   0xd   : > { %273 = sbr.rel (%p270_p6) target bundleno = 467 (0x1d3), region = 44  ;;  %s308_s24 = sand.u32 (!%p270_p6), 1, %s1985_s26  }
   0xe   : > { %p322_p7 = scmp.lt.s32.totalorder (!%p270_p6), %s2135_s13, 24  ;;  %s2494_s25 = smul.u32 (!%p270_p6), 104, %s308_s24 }
  0x10   : > { %s2509_s8 = scalar_lea.vmem (!%p270_p6), [#allocation4], %s2494_s25   ;;  %s2516_s11 = scalar_lea.vmem (!%p270_p6), [#allocation3], %s2494_s25  }
  0x12   : > { %v439_v0 = vld [vmem:[%s2789_s1] sm:$0xff]  ;;  %s2139_s14 = scalar_select %p322_p7, %s2135_s13, 24  ;;  %vm399_vm0 = vcmask 64512   ;;  %vm1132_vm1 = vcmask 130048  }
  0x13   : > { %v494_v1 = vand.u32 4294901760, %v439_v0  ;;  %v2144_v4 = vld [vmem:[%s2792_s4] ss:$0 sm:$0xff]  ;;  %s1171_s12 = ssub.s32 (%p2127_p4), 25, %s2135_s13 }
  0x14   : > { %s1684_s17 = sshll.u32 %s2139_s14, 3  ;;  %s1708_s14 = smul.u32 (%p2127_p4), 104, %s2115_s5 }
  0x15   : > { %1710 = vmatpush.msra.mxu2 %v494_v1  ;;  %v617_v2 = vsub.f32 %v439_v0, %v494_v1  ;;  %495 = vmatpush.msra.mxu0 %v494_v1  ;;  %s2152_s20 = scalar_lea.vmem %s2788_s0, %s1684_s17  ;;  %s2502_s30 = scalar_lea.vmem %s2791_s3, %s1684_s17 }
  0x16   : > { %v363_v6 = vld [vmem:[%s2152_s20 + $0x38] sm:$0xff]  ;;  %v356_v7 = vld [vmem:[%s2152_s20] sm:$0xff]  ;;  %v357_v13 = vld [vmem:[%s2152_s20 + $0x8] sm:$0xff]  ;;  %p1172_p8 = scmp.lt.s32.totalorder (%p2127_p4), %s1171_s12, 13  ;;  %s2619_s17 = scalar_lea.vmem (%p2127_p4), %s2794_s6, %s1708_s14  }
  0x17   : > { %v618_v3 = vand.u32 4294901760, %v617_v2  ;;  %692 = vmatpush.msrb.mxu2 %v617_v2  ;;  %v364_v8 = vld [vmem:[%s2152_s20 + $0x40] sm:$0xff]  ;;  %v2158_v10 = vmul.f32 %v2144_v4, %v363_v6  ;;  %v2161_v11 = vmul.f32 %v2144_v4, %v356_v7  ;;  %v365_v14 = vld [vmem:[%s2152_s20 + $0x48] sm:$0xff]  ;;  %v358_v15 = vld [vmem:[%s2152_s20 + $0x10] sm:$0xff]  ;;  %v2170_v16 = vmul.f32 %v2144_v4, %v357_v13 }
  0x18   : > { %v2164_v12 = vmul.f32 %v2144_v4, %v364_v8  ;;  %v2173_v17 = vmul.f32 %v2144_v4, %v365_v14  ;;  %v2176_v18 = vmul.f32 %v2144_v4, %v358_v15  ;;  %v366_v32 = vld [vmem:[%s2152_s20 + $0x50] sm:$0xff]  ;;  %v359_v36 = vld [vmem:[%s2152_s20 + $0x18] sm:$0xff]  ;;  %v360_v54 = vld [vmem:[%s2152_s20 + $0x20] sm:$0xff] }
  0x19   : > { %v619_v5 = vsub.f32 %v617_v2, %v618_v3  ;;  %873 = vmatpush.msrb.mxu0 %v618_v3  ;;  %v462_v19 = vsel %vm399_vm0, %v2158_v10, 0  ;;  %v441_v20 = vsel %vm399_vm0, %v2161_v11, 0  ;;  %v444_v25 = vsel %vm399_vm0, %v2170_v16, 0  ;;  %v367_v53 = vld [vmem:[%s2152_s20 + $0x58] sm:$0xff]  ;;  %v368_v3 = vld [vmem:[%s2152_s20 + $0x60] sm:$0xff]  ;;  %v361_v7 = vld [vmem:[%s2152_s20 + $0x28] sm:$0xff] }
  0x1a   : > { %v465_v21 = vsel %vm399_vm0, %v2164_v12, 0  ;;  %v2184_v22 = vand.u32 4294901760, %v462_v19  ;;  %v2186_v23 = vand.u32 4294901760, %v441_v20  ;;  %v2192_v26 = vand.u32 4294901760, %v444_v25 }
  0x1b   : > { %v620_v9 = vand.u32 4294901760, %v619_v5  ;;  %v2188_v24 = vand.u32 4294901760, %v465_v21  ;;  %v468_v27 = vsel %vm399_vm0, %v2173_v17, 0  ;;  %v447_v31 = vsel %vm399_vm0, %v2176_v18, 0 }
  0x1c   : > { %v2197_v28 = vsub.f32 %v462_v19, %v2184_v22  ;;  %v2201_v29 = vsub.f32 %v441_v20, %v2186_v23  ;;  %v2211_v33 = vsub.f32 %v444_v25, %v2192_v26  ;;  %v2216_v37 = vand.u32 4294901760, %v468_v27 }
  0x1d   : > { %1711 = vmatpush.msra.mxu3 %v620_v9  ;;  %621 = vmatpush.msra.mxu1 %v620_v9  ;;  %v2205_v30 = vsub.f32 %v465_v21, %v2188_v24  ;;  %v2218_v38 = vand.u32 4294901760, %v447_v31  ;;  %v2221_v39 = vmul.f32 %v2144_v4, %v366_v32  ;;  %v2232_v44 = vmul.f32 %v2144_v4, %v359_v36 }
  0x1e   : > { %651 = vmatmul.f32.vlgmr.msra.gmra.mxu3 %v2184_v22  ;;  %623 = vmatmul.f32.vlgmr.msra.gmra.mxu1 %v2186_v23  ;;  %v554_v34 = vand.u32 4294901760, %v2197_v28  ;;  %v498_v35 = vand.u32 4294901760, %v2201_v29  ;;  %v506_v43 = vand.u32 4294901760, %v2211_v33  ;;  %v2235_v47 = vsub.f32 %v468_v27, %v2216_v37 }
  0x1f   : > { %775 = vmatpush.msrb.mxu3 %v494_v1  ;;  %943 = vmatpush.msrb.mxu1 %v494_v1  ;;  %v562_v42 = vand.u32 4294901760, %v2205_v30  ;;  %v2244_v50 = vsub.f32 %v447_v31, %v2218_v38  ;;  %v471_v51 = vsel %vm399_vm0, %v2221_v39, 0  ;;  %v450_v52 = vsel %vm399_vm0, %v2232_v44, 0 }
  0x20   : > { %v555_v40 = vsub.f32 %v2197_v28, %v554_v34  ;;  %v499_v41 = vsub.f32 %v2201_v29, %v498_v35  ;;  %v507_v49 = vsub.f32 %v2211_v33, %v506_v43  ;;  %v570_v55 = vand.u32 4294901760, %v2235_v47 }
  0x21   : > { %v563_v48 = vsub.f32 %v2205_v30, %v562_v42  ;;  %v2255_v56 = vand.u32 4294901760, %v471_v51  ;;  %v514_v59 = vand.u32 4294901760, %v2244_v50  ;;  %v2258_v60 = vand.u32 4294901760, %v450_v52 }
  0x22   : > { %v556_v45 = vand.u32 4294901760, %v555_v40  ;;  %v500_v46 = vand.u32 4294901760, %v499_v41  ;;  %v508_v58 = vand.u32 4294901760, %v507_v49  ;;  %v2261_v61 = vmul.f32 %v2144_v4, %v367_v53  ;;  %v362_v41 = vld [vmem:[%s2152_s20 + $0x30] sm:$0xff] }
  0x23   : > { %v564_v57 = vand.u32 4294901760, %v563_v48  ;;  %v2264_v62 = vmul.f32 %v2144_v4, %v360_v54  ;;  %v571_v63 = vsub.f32 %v2235_v47, %v570_v55  ;;  %v2270_v0 = vsub.f32 %v471_v51, %v2255_v56 }
  0x24   : > { %557 = vmatmul.f32.vlgmr.msra.gmra.mxu2 %v556_v45  ;;  %501 = vmatmul.f32.vlgmr.msra.gmra.mxu0 %v500_v46  ;;  %v515_v1 = vsub.f32 %v2244_v50, %v514_v59  ;;  %v2276_v2 = vsub.f32 %v450_v52, %v2258_v60  ;;  %v474_v5 = vsel %vm399_vm0, %v2261_v61, 0  ;;  %v2288_v13 = vmul.f32 %v2144_v4, %v368_v3 }
  0x25   : > { %v453_v6 = vsel %vm399_vm0, %v2264_v62, 0  ;;  %v572_v8 = vand.u32 4294901760, %v571_v63  ;;  %v578_v9 = vand.u32 4294901760, %v2270_v0  ;;  %v2291_v19 = vand.u32 4294901760, %v474_v5 }
  0x26   : > { %655 = vmatmul.f32.gmra.mxu3 %v2188_v24  ;;  %627 = vmatmul.f32.gmra.mxu1 %v2192_v26  ;;  %v516_v14 = vand.u32 4294901760, %v515_v1  ;;  %v522_v15 = vand.u32 4294901760, %v2276_v2  ;;  %v2293_v20 = vand.u32 4294901760, %v453_v6  ;;  %v2296_v21 = vmul.f32 %v2144_v4, %v361_v7 }
  0x27   : > { %v579_v25 = vsub.f32 %v2270_v0, %v578_v9  ;;  %v2305_v31 = vsub.f32 %v474_v5, %v2291_v19  ;;  %v477_v36 = vsel %vm399_vm0, %v2288_v13, 0  ;;  %v2324_v53 = vmul.f32 %v2144_v4, %v362_v41 }
  0x28   : > { %v523_v27 = vsub.f32 %v2276_v2, %v522_v15  ;;  %v2308_v32 = vsub.f32 %v453_v6, %v2293_v20  ;;  %v456_v40 = vsel %vm399_vm0, %v2296_v21, 0  ;;  %v2317_v46 = vand.u32 4294901760, %v477_v36 }
  0x29   : > { %v580_v45 = vand.u32 4294901760, %v579_v25  ;;  %v586_v49 = vand.u32 4294901760, %v2305_v31  ;;  %v2321_v52 = vand.u32 4294901760, %v456_v40  ;;  %v459_v4 = vsel %vm399_vm0, %v2324_v53, 0 }
  0x2a   : > { %v524_v48 = vand.u32 4294901760, %v523_v27  ;;  %v530_v51 = vand.u32 4294901760, %v2308_v32  ;;  %v2327_v54 = vsub.f32 %v477_v36, %v2317_v46  ;;  %v2344_v7 = vand.u32 4294901760, %v459_v4 }
  0x2b   : > { %v2336_v63 = vsub.f32 %v456_v40, %v2321_v52  ;;  %v386_v27 = vmul.f32 %v2161_v11, %v2161_v11 }
  0x2c   : > { %565 = vmatmul.f32.gmra.mxu2 %v564_v57  ;;  %509 = vmatmul.f32.gmra.mxu0 %v508_v58  ;;  %v587_v57 = vsub.f32 %v2305_v31, %v586_v49  ;;  %v531_v58 = vsub.f32 %v2308_v32, %v530_v51  ;;  %v594_v1 = vand.u32 4294901760, %v2327_v54  ;;  %v545_v25 = vsub.f32 %v459_v4, %v2344_v7 }
  0x2d   : > { %v538_v6 = vand.u32 4294901760, %v2336_v63  ;;  %v400_v36 = vsel %vm399_vm0, %v386_v27, 0.0  ;;  %v388_v4 = vmul.f32 %v2176_v18, %v2176_v18 }
  0x2e   : > { %659 = vmatmul.f32.gmra.mxu3 %v2216_v37  ;;  %631 = vmatmul.f32.gmra.mxu1 %v2218_v38  ;;  %v588_v3 = vand.u32 4294901760, %v587_v57  ;;  %v532_v5 = vand.u32 4294901760, %v531_v58  ;;  %v387_v57 = vmul.f32 %v2170_v16, %v2170_v16 }
  0x2f   : > { %401 = vadd.xlane.f32.xlu0 %v400_v36  ;;  %v406_v16 = vsel %vm399_vm0, %v388_v4, 0.0 }
  0x30   : > { %v403_v11 = vsel %vm399_vm0, %v387_v57, 0.0  ;;  %407 = vadd.xlane.f32.xlu1 %v406_v16 }
  0x34   : > { %573 = vmatmul.f32.gmra.mxu2 %v572_v8  ;;  %517 = vmatmul.f32.gmra.mxu0 %v516_v14  ;;  %v595_v8 = vsub.f32 %v2327_v54, %v594_v1  ;;  %v539_v14 = vsub.f32 %v2336_v63, %v538_v6 }
  0x36   : > { %663 = vmatmul.f32.gmra.mxu3 %v2255_v56  ;;  %635 = vmatmul.f32.gmra.mxu1 %v2258_v60  ;;  %v596_v40 = vand.u32 4294901760, %v595_v8  ;;  %v540_v41 = vand.u32 4294901760, %v539_v14 }
  0x37   : > { %404 = vadd.xlane.f32.xlu0 %v403_v11 }
  0x3c   : > { %581 = vmatmul.f32.gmra.mxu2 %v580_v45  ;;  %525 = vmatmul.f32.gmra.mxu0 %v524_v48  ;;  %v546_v45 = vand.u32 4294901760, %v545_v25 }
  0x3e   : > { %667 = vmatmul.f32.gmra.mxu3 %v2291_v19  ;;  %639 = vmatmul.f32.gmra.mxu1 %v2293_v20  ;;  %v547_v48 = vsub.f32 %v545_v25, %v546_v45 }
  0x40   : > { %v548_v58 = vand.u32 4294901760, %v547_v48 }
  0x44   : > { %589 = vmatmul.f32.gmra.mxu2 %v588_v3  ;;  %533 = vmatmul.f32.gmra.mxu0 %v532_v5 }
  0x46   : > { %671 = vmatmul.f32.gmra.mxu3 %v2317_v46  ;;  %643 = vmatmul.f32.gmra.mxu1 %v2321_v52 }
  0x4c   : > { %597 = vmatmul.f32.gmra.mxu2 %v596_v40  ;;  %541 = vmatmul.f32.gmra.mxu0 %v540_v41 }
  0x4e   : > { %647 = vmatmul.f32.gmra.mxu1 %v2344_v7  ;;  %779 = vmatmul.f32.vlgmr.msrb.gmra.mxu3 %v498_v35  ;;  %v389_v35 = vmul.f32 %v2232_v44, %v2232_v44  ;;  %v393_v44 = vmul.f32 %v2158_v10, %v2158_v10  ;;  %v395_v10 = vmul.f32 %v2173_v17, %v2173_v17 }
  0x50   : > { %v409_v18 = vsel %vm399_vm0, %v389_v35, 0.0 }
  0x51   : > { %410 = vadd.xlane.f32.xlu1 %v409_v18 }
  0x54   : > { %695 = vmatmul.f32.vlgmr.msrb.gmra.mxu2 %v2201_v29  ;;  %549 = vmatmul.f32.gmra.mxu0 %v548_v58  ;;  %v390_v29 = vmul.f32 %v2264_v62, %v2264_v62 }
  0x56   : > { %785 = vmatmul.f32.gmra.mxu3 %v506_v43  ;;  %945 = vmatmul.f32.vlgmr.msrb.gmra.mxu1 %v2186_v23  ;;  %v392_v43 = vmul.f32 %v2324_v53, %v2324_v53 }
  0x5c   : > { %700 = vmatmul.f32.gmra.mxu2 %v2211_v33  ;;  %875 = vmatmul.f32.vlgmr.msrb.gmra.mxu0 %v2186_v23  ;;  %v412_v23 = vsel %vm399_vm0, %v390_v29, 0.0  ;;  %v391_v33 = vmul.f32 %v2296_v21, %v2296_v21  ;;  %v2486_v29 = vld [vmem:[%s2790_s2] ss:$0 sm:$0xff] }
  0x5d   : > { %413 = vadd.xlane.f32.xlu2 %v412_v23 }
  0x5e   : > { %791 = vmatmul.f32.gmra.mxu3 %v514_v59  ;;  %949 = vmatmul.f32.gmra.mxu1 %v2192_v26  ;;  %v394_v59 = vmul.f32 %v2164_v12, %v2164_v12  ;;  %v396_v12 = vmul.f32 %v2221_v39, %v2221_v39 }
  0x64   : > { %705 = vmatmul.f32.gmra.mxu2 %v2244_v50  ;;  %879 = vmatmul.f32.gmra.mxu0 %v2192_v26  ;;  %v415_v26 = vsel %vm399_vm0, %v391_v33, 0.0  ;;  %v421_v50 = vsel %vm399_vm0, %v393_v44, 0.0 }
  0x65   : > { %416 = vadd.xlane.f32.xlu2 %v415_v26  ;;  %422 = vadd.xlane.f32.xlu1 %v421_v50 }
  0x66   : > { %797 = vmatmul.f32.gmra.mxu3 %v522_v15  ;;  %953 = vmatmul.f32.gmra.mxu1 %v2218_v38 }
  0x6c   : > { %710 = vmatmul.f32.gmra.mxu2 %v2276_v2  ;;  %883 = vmatmul.f32.gmra.mxu0 %v2218_v38  ;;  %v418_v38 = vsel %vm399_vm0, %v392_v43, 0.0 }
  0x6d   : > { %419 = vadd.xlane.f32.xlu0 %v418_v38  ;;  %v2488_v38 = vstv %s355_s21 }
  0x6e   : > { %803 = vmatmul.f32.gmra.mxu3 %v530_v51  ;;  %957 = vmatmul.f32.gmra.mxu1 %v2258_v60 }
  0x74   : > { %715 = vmatmul.f32.gmra.mxu2 %v2308_v32  ;;  %887 = vmatmul.f32.gmra.mxu0 %v2258_v60  ;;  %v424_v60 = vsel %vm399_vm0, %v394_v59, 0.0 }
  0x75   : > { %425 = vadd.xlane.f32.xlu2 %v424_v60 }
  0x76   : > { %809 = vmatmul.f32.gmra.mxu3 %v538_v6  ;;  %961 = vmatmul.f32.gmra.mxu1 %v2293_v20 }
  0x7c   : > { %720 = vmatmul.f32.gmra.mxu2 %v2336_v63  ;;  %891 = vmatmul.f32.gmra.mxu0 %v2293_v20 }
  0x7e   : > { %815 = vmatmul.f32.gmra.mxu3 %v546_v45  ;;  %965 = vmatmul.f32.gmra.mxu1 %v2321_v52 }
  0x84   : > { %725 = vmatmul.f32.gmra.mxu2 %v545_v25  ;;  %895 = vmatmul.f32.gmra.mxu0 %v2321_v52 }
  0x86   : > { %821 = vmatmul.f32.gmra.mxu3 %v554_v34  ;;  %969 = vmatmul.f32.gmra.mxu1 %v2344_v7  ;;  %v427_v34 = vsel %vm399_vm0, %v395_v10, 0.0 }
  0x87   : > { %428 = vadd.xlane.f32.xlu0 %v427_v34 }
  0x8c   : > { %730 = vmatmul.f32.gmra.mxu2 %v2197_v28  ;;  %899 = vmatmul.f32.gmra.mxu0 %v2344_v7 }
  0x8e   : > { %827 = vmatmul.f32.gmra.mxu3 %v562_v42  ;;  %973 = vmatmul.f32.gmra.mxu1 %v2184_v22  ;;  %v430_v42 = vsel %vm399_vm0, %v396_v12, 0.0 }
  0x8f   : > { %431 = vadd.xlane.f32.xlu1 %v430_v42 }
  0x94   : > { %735 = vmatmul.f32.gmra.mxu2 %v2205_v30  ;;  %903 = vmatmul.f32.gmra.mxu0 %v2184_v22  ;;  %v397_v22 = vmul.f32 %v2261_v61, %v2261_v61 }
  0x96   : > { %833 = vmatmul.f32.gmra.mxu3 %v570_v55  ;;  %977 = vmatmul.f32.gmra.mxu1 %v2188_v24  ;;  %v433_v39 = vsel %vm399_vm0, %v397_v22, 0.0 }
  0x97   : > { %434 = vadd.xlane.f32.xlu2 %v433_v39 }
  0x9b   : > { %v624_v28 = vpop.f32.mrf.mxu1 }
  0x9c   : > { %740 = vmatmul.f32.gmra.mxu2 %v2235_v47  ;;  %907 = vmatmul.f32.gmra.mxu0 %v2188_v24  ;;  %v398_v47 = vmul.f32 %v2288_v13, %v2288_v13 }
  0x9e   : > { %839 = vmatmul.f32.gmra.mxu3 %v578_v9  ;;  %981 = vmatmul.f32.gmra.mxu1 %v2216_v37  ;;  %v436_v9 = vsel %vm399_vm0, %v398_v47, 0.0 }
  0x9f   : > { %437 = vadd.xlane.f32.xlu0 %v436_v9 }
  0xa1   : > { %v652_v17 = vpop.f32.mrf.mxu3  ;;  %v502_v30 = vpop.f32.mrf.mxu0 }
  0xa2   : > { %v625_v36 = vadd.f32 %v624_v28, %v502_v30  ;;  %v402_v41 = vpop.xlane.xlu0 %401 }
  0xa3   : > { %v628_v55 = vpop.f32.mrf.mxu1  ;;  %v997_v16 = vmul.f32 0.5, %v402_v41  ;;  %v408_v39 = vpop.xlane.xlu1 %407 }
  0xa4   : > { %745 = vmatmul.f32.gmra.mxu2 %v2270_v0  ;;  %911 = vmatmul.f32.gmra.mxu0 %v2216_v37 }
  0xa6   : > { %845 = vmatmul.f32.gmra.mxu3 %v586_v49  ;;  %985 = vmatmul.f32.gmra.mxu1 %v2255_v56 }
  0xa7   : > { %v558_v24 = vpop.f32.mrf.mxu2 }
  0xa8   : > { %v2443_v62 = vadd.f32 %v652_v17, %v558_v24 }
  0xa9   : > { %v656_v61 = vpop.f32.mrf.mxu3  ;;  %v510_v2 = vpop.f32.mrf.mxu0 }
  0xaa   : > { %v629_v35 = vadd.f32 %v628_v55, %v510_v2  ;;  %v405_v50 = vpop.xlane.xlu0 %404 }
  0xab   : > { %v2446_v15 = vpop.f32.mrf.mxu1  ;;  %v998_v28 = vmul.f32 0.5, %v405_v50 }
  0xac   : > { %750 = vmatmul.f32.gmra.mxu2 %v2305_v31  ;;  %915 = vmatmul.f32.gmra.mxu0 %v2255_v56 }
  0xae   : > { %851 = vmatmul.f32.gmra.mxu3 %v594_v1  ;;  %989 = vmatmul.f32.gmra.mxu1 %v2291_v19 }
  0xaf   : > { %v566_v37 = vpop.f32.mrf.mxu2 }
  0xb0   : > { %v2453_v0 = vadd.f32 %v656_v61, %v566_v37 }
  0xb1   : > { %v660_v13 = vpop.f32.mrf.mxu3  ;;  %v518_v20 = vpop.f32.mrf.mxu0 }
  0xb2   : > { %v633_v42 = vadd.f32 %v2446_v15, %v518_v20  ;;  %v999_v20 = vmul.f32 0.5, %v408_v39 }
  0xb3   : > { %v2455_v21 = vpop.f32.mrf.mxu1 }
  0xb4   : > { %755 = vmatmul.f32.gmra.mxu2 %v2327_v54  ;;  %919 = vmatmul.f32.gmra.mxu0 %v2291_v19 }
  0xb6   : > { %993 = vmatmul.f32.gmra.mxu1 %v2317_v46 }
  0xb7   : > { %v574_v31 = vpop.f32.mrf.mxu2 }
  0xb8   : > { %v2460_v56 = vadd.f32 %v660_v13, %v574_v31 }
  0xb9   : > { %v664_v32 = vpop.f32.mrf.mxu3  ;;  %v2462_v49 = vpop.f32.mrf.mxu0 }
  0xbb   : > { %v2464_v51 = vpop.f32.mrf.mxu1 }
  0xbc   : > { %923 = vmatmul.f32.gmra.mxu0 %v2317_v46 }
  0xbf   : > { %v582_v52 = vpop.f32.mrf.mxu2 }
  0xc0   : > { %v2467_v53 = vadd.f32 %v664_v32, %v582_v52  ;;  %v637_v32 = vadd.f32 %v2455_v21, %v2462_v49  ;;  %v1080_v52 = vld [vmem:[%s2502_s30] sm:$0xff] }
  0xc1   : > { %v668_v63 = vpop.f32.mrf.mxu3  ;;  %v2469_v1 = vpop.f32.mrf.mxu0 }
  0xc3   : > { %v2471_v54 = vpop.f32.mrf.mxu1 }
  0xc7   : > { %v590_v19 = vpop.f32.mrf.mxu2 }
  0xc8   : > { %v2473_v3 = vadd.f32 %v668_v63, %v590_v19 }
  0xc9   : > { %v672_v5 = vpop.f32.mrf.mxu3  ;;  %v2475_v6 = vpop.f32.mrf.mxu0 }
  0xca   : > { %v645_v39 = vadd.f32 %v2471_v54, %v2475_v6 }
  0xcb   : > { %v2477_v7 = vpop.f32.mrf.mxu1 }
  0xcf   : > { %v598_v8 = vpop.f32.mrf.mxu2 }
  0xd0   : > { %v2479_v14 = vadd.f32 %v672_v5, %v598_v8 }
  0xd1   : > { %v780_v46 = vpop.f32.mrf.mxu3  ;;  %v2481_v25 = vpop.f32.mrf.mxu0 }
  0xd3   : > { %v946_v27 = vpop.f32.mrf.mxu1 }
  0xd7   : > { %v696_v40 = vpop.f32.mrf.mxu2 }
  0xd8   : > { %v697_v45 = vadd.f32 %v696_v40, %v625_v36 }
  0xd9   : > { %v786_v48 = vpop.f32.mrf.mxu3  ;;  %v876_v57 = vpop.f32.mrf.mxu0 }
  0xda   : > { %v781_v11 = vadd.f32 %v780_v46, %v697_v45  ;;  %v411_v45 = vpop.xlane.xlu1 %410 }
  0xdb   : > { %v950_v58 = vpop.f32.mrf.mxu1 }
  0xdc   : > { %v877_v4 = vadd.f32 %v876_v57, %v781_v11 }
  0xde   : > { %v947_v18 = vadd.f32 %v946_v27, %v877_v4  ;;  %v1000_v4 = vmul.f32 0.5, %v411_v45 }
  0xdf   : > { %v701_v23 = vpop.f32.mrf.mxu2 }
  0xe0   : > { %v1010_v33 = vsub.f32 %v947_v18, %v997_v16  ;;  %v702_v26 = vadd.f32 %v701_v23, %v629_v35  ;;  %v641_v35 = vadd.f32 %v2464_v51, %v2469_v1  ;;  %v1081_v18 = vld [vmem:[%s2502_s30 + $0x8] sm:$0xff] }
  0xe1   : > { %v792_v43 = vpop.f32.mrf.mxu3  ;;  %v880_v44 = vpop.f32.mrf.mxu0 }
  0xe2   : > { %v1027_v59 = vadd.f32 %v2486_v29, %v1010_v33  ;;  %v787_v60 = vadd.f32 %v786_v48, %v702_v26 }
  0xe3   : > { %v954_v10 = vpop.f32.mrf.mxu1 }
  0xe4   : > { %v1041_v34 = vmin.f32 %v1027_v59, %v2488_v38  ;;  %v881_v12 = vadd.f32 %v880_v44, %v787_v60  ;;  %v414_v44 = vpop.xlane.xlu2 %413 }
  0xe6   : > { %v1054_v17 = vmul.f32 1.442695, %v1041_v34  ;;  %v951_v22 = vadd.f32 %v950_v58, %v881_v12 }
  0xe7   : > { %v706_v30 = vpop.f32.mrf.mxu2 }
  0xe8   : > { %1869 = vpow2.f32 %v1054_v17  ;;  %v1011_v55 = vsub.f32 %v951_v22, %v998_v28  ;;  %v707_v24 = vadd.f32 %v706_v30, %v633_v42  ;;  %v1001_v22 = vmul.f32 0.5, %v414_v44 }
  0xe9   : > { %v798_v47 = vpop.f32.mrf.mxu3  ;;  %v884_v61 = vpop.f32.mrf.mxu0 }
  0xea   : > { %v1028_v2 = vadd.f32 %v2486_v29, %v1011_v55  ;;  %v793_v9 = vadd.f32 %v792_v43, %v707_v24  ;;  %v1082_v55 = vld [vmem:[%s2502_s30 + $0x10] sm:$0xff] }
  0xeb   : > { %v958_v37 = vpop.f32.mrf.mxu1 }
  0xec   : > { %v1042_v15 = vmin.f32 %v1028_v2, %v2488_v38  ;;  %v885_v13 = vadd.f32 %v884_v61, %v793_v9 }
  0xee   : > { %v1870_v31 = vpop.eup %1869  ;;  %v1056_v63 = vmul.f32 1.442695, %v1042_v15  ;;  %v955_v19 = vadd.f32 %v954_v10, %v885_v13 }
  0xef   : > { %v1093_v5 = vmul.f32 0.5, %v1870_v31  ;;  %1146 = vst.msk [vmem:[%s2509_s8] sm:$0xff] %vm1132_vm1, %v1870_v31  ;;  %v711_v8 = vpop.f32.mrf.mxu2 }
  0xf0   : > { %1871 = vpow2.f32 %v1056_v63  ;;  %v1012_v46 = vsub.f32 %v955_v19, %v999_v20  ;;  %v712_v27 = vadd.f32 %v711_v8, %v637_v32 }
  0xf1   : > { %v804_v36 = vpop.f32.mrf.mxu3  ;;  %v1106_v40 = vsub.f32 %v1080_v52, %v1093_v5  ;;  %v888_v41 = vpop.f32.mrf.mxu0 }
  0xf2   : > { %v1029_v21 = vadd.f32 %v2486_v29, %v1012_v46  ;;  %v799_v49 = vadd.f32 %v798_v47, %v712_v27  ;;  %v649_v46 = vadd.f32 %v2477_v7, %v2481_v25  ;;  %v1083_v27 = vld [vmem:[%s2502_s30 + $0x18] sm:$0xff] }
  0xf3   : > { %v962_v48 = vpop.f32.mrf.mxu1  ;;  %v1119_v57 = vmul.f32 %v1870_v31, %v1106_v40  ;;  %v417_v31 = vpop.xlane.xlu2 %416 }
  0xf4   : > { %v1043_v11 = vmin.f32 %v1029_v21, %v2488_v38  ;;  %v889_v58 = vadd.f32 %v888_v41, %v799_v49  ;;  %v1002_v5 = vmul.f32 0.5, %v417_v31 }
  0xf5   : > { %1133 = vst.msk [vmem:[%s2516_s11] sm:$0xff] %vm1132_vm1, %v1119_v57 }
  0xf6   : > { %v1872_v16 = vpop.eup %1871  ;;  %v1058_v23 = vmul.f32 1.442695, %v1043_v11  ;;  %v959_v33 = vadd.f32 %v958_v37, %v889_v58  ;;  %v420_v58 = vpop.xlane.xlu0 %419 }
  0xf7   : > { %v1094_v26 = vmul.f32 0.5, %v1872_v16  ;;  %1147 = vst.msk [vmem:[%s2509_s8 + $0x8] sm:$0xff] %vm1132_vm1, %v1872_v16  ;;  %v716_v43 = vpop.f32.mrf.mxu2 }
  0xf8   : > { %1873 = vpow2.f32 %v1058_v23  ;;  %v1013_v50 = vsub.f32 %v959_v33, %v1000_v4  ;;  %v717_v59 = vadd.f32 %v716_v43, %v641_v35  ;;  %v1003_v23 = vmul.f32 0.5, %v420_v58 }
  0xf9   : > { %v810_v60 = vpop.f32.mrf.mxu3  ;;  %v1107_v10 = vsub.f32 %v1081_v18, %v1094_v26  ;;  %v892_v34 = vpop.f32.mrf.mxu0  ;;  %v1084_v26 = vld [vmem:[%s2502_s30 + $0x20] sm:$0xff] }
  0xfa   : > { %v1030_v12 = vadd.f32 %v2486_v29, %v1013_v50  ;;  %v805_v51 = vadd.f32 %v804_v36, %v717_v59 }
  0xfb   : > { %v966_v1 = vpop.f32.mrf.mxu1  ;;  %v1120_v28 = vmul.f32 %v1872_v16, %v1107_v10 }
  0xfc   : > { %v1044_v42 = vmin.f32 %v1030_v12, %v2488_v38  ;;  %v893_v17 = vadd.f32 %v892_v34, %v805_v51 }
  0xfd   : > { %1134 = vst.msk [vmem:[%s2516_s11 + $0x8] sm:$0xff] %vm1132_vm1, %v1120_v28 }
  0xfe   : > { %v1874_v30 = vpop.eup %1873  ;;  %v1060_v24 = vmul.f32 1.442695, %v1044_v42  ;;  %v963_v47 = vadd.f32 %v962_v48, %v893_v17 }
  0xff   : > { %v1095_v61 = vmul.f32 0.5, %v1874_v30  ;;  %1148 = vst.msk [vmem:[%s2509_s8 + $0x10] sm:$0xff] %vm1132_vm1, %v1874_v30  ;;  %v721_v2 = vpop.f32.mrf.mxu2 }
 0x100   : > { %1875 = vpow2.f32 %v1060_v24  ;;  %v1014_v9 = vsub.f32 %v963_v47, %v1001_v22  ;;  %v722_v37 = vadd.f32 %v721_v2, %v645_v39  ;;  %v1085_v47 = vld [vmem:[%s2502_s30 + $0x28] sm:$0xff] }
 0x101   : > { %v816_v15 = vpop.f32.mrf.mxu3  ;;  %v1108_v13 = vsub.f32 %v1082_v55, %v1095_v61  ;;  %v896_v20 = vpop.f32.mrf.mxu0 }
 0x102   : > { %v1031_v32 = vadd.f32 %v2486_v29, %v1014_v9  ;;  %v811_v54 = vadd.f32 %v810_v60, %v722_v37 }
 0x103   : > { %v970_v6 = vpop.f32.mrf.mxu1  ;;  %v1121_v52 = vmul.f32 %v1874_v30, %v1108_v13  ;;  %v426_v13 = vpop.xlane.xlu2 %425 }
 0x104   : > { %v1045_v63 = vmin.f32 %v1031_v32, %v2488_v38  ;;  %v897_v19 = vadd.f32 %v896_v20, %v811_v54 }
 0x105   : > { %1135 = vst.msk [vmem:[%s2516_s11 + $0x10] sm:$0xff] %vm1132_vm1, %v1121_v52 }
 0x106   : > { %v1876_v8 = vpop.eup %1875  ;;  %v1062_v36 = vmul.f32 1.442695, %v1045_v63  ;;  %v967_v40 = vadd.f32 %v966_v1, %v897_v19  ;;  %v423_v1 = vpop.xlane.xlu1 %422 }
 0x107   : > { %v1096_v41 = vmul.f32 0.5, %v1876_v8  ;;  %1149 = vst.msk [vmem:[%s2509_s8 + $0x18] sm:$0xff] %vm1132_vm1, %v1876_v8  ;;  %v726_v45 = vpop.f32.mrf.mxu2  ;;  %v1004_v55 = vmul.f32 0.5, %v423_v1 }
 0x108   : > { %1877 = vpow2.f32 %v1062_v36  ;;  %v1015_v21 = vsub.f32 %v967_v40, %v1002_v5  ;;  %v727_v49 = vadd.f32 %v726_v45, %v649_v46  ;;  %v1005_v5 = vmul.f32 0.5, %v426_v13 }
 0x109   : > { %v822_v48 = vpop.f32.mrf.mxu3  ;;  %v1109_v57 = vsub.f32 %v1083_v27, %v1096_v41  ;;  %v900_v11 = vpop.f32.mrf.mxu0  ;;  %v1086_v27 = vld [vmem:[%s2502_s30 + $0x30] sm:$0xff] }
 0x10a   : > { %v1032_v4 = vadd.f32 %v2486_v29, %v1015_v21  ;;  %v817_v7 = vadd.f32 %v816_v15, %v727_v49 }
 0x10b   : > { %v974_v25 = vpop.f32.mrf.mxu1  ;;  %v1122_v16 = vmul.f32 %v1876_v8, %v1109_v57  ;;  %v429_v57 = vpop.xlane.xlu0 %428 }
 0x10c   : > { %v1046_v35 = vmin.f32 %v1032_v4, %v2488_v38  ;;  %v901_v18 = vadd.f32 %v900_v11, %v817_v7 }
 0x10d   : > { %1136 = vst.msk [vmem:[%s2516_s11 + $0x18] sm:$0xff] %vm1132_vm1, %v1122_v16 }
 0x10e   : > { %v1878_v33 = vpop.eup %1877  ;;  %v1064_v43 = vmul.f32 1.442695, %v1046_v35  ;;  %v971_v44 = vadd.f32 %v970_v6, %v901_v18  ;;  %v1006_v35 = vmul.f32 0.5, %v429_v57 }
 0x10f   : > { %v1097_v50 = vmul.f32 0.5, %v1878_v33  ;;  %1150 = vst.msk [vmem:[%s2509_s8 + $0x20] sm:$0xff] %vm1132_vm1, %v1878_v33  ;;  %v731_v59 = vpop.f32.mrf.mxu2 }
 0x110   : > { %1879 = vpow2.f32 %v1064_v43  ;;  %v1016_v60 = vsub.f32 %v971_v44, %v1003_v23  ;;  %v732_v10 = vadd.f32 %v731_v59, %v2443_v62  ;;  %v1087_v23 = vld [vmem:[%s2502_s30 + $0x38] sm:$0xff] }
 0x111   : > { %v828_v34 = vpop.f32.mrf.mxu3  ;;  %v1110_v12 = vsub.f32 %v1084_v26, %v1097_v50  ;;  %v904_v51 = vpop.f32.mrf.mxu0 }
 0x112   : > { %v1033_v28 = vadd.f32 %v2486_v29, %v1016_v60  ;;  %v823_v42 = vadd.f32 %v822_v48, %v732_v10 }
 0x113   : > { %v1123_v17 = vmul.f32 %v1878_v33, %v1110_v12  ;;  %v978_v22 = vpop.f32.mrf.mxu1 }
 0x114   : > { %v1047_v30 = vmin.f32 %v1033_v28, %v2488_v38  ;;  %v905_v39 = vadd.f32 %v904_v51, %v823_v42 }
 0x115   : > { %1137 = vst.msk [vmem:[%s2516_s11 + $0x20] sm:$0xff] %vm1132_vm1, %v1123_v17 }
 0x116   : > { %v1880_v24 = vpop.eup %1879  ;;  %v1066_v61 = vmul.f32 1.442695, %v1047_v30  ;;  %v975_v62 = vadd.f32 %v974_v25, %v905_v39  ;;  %v1088_v39 = vld [vmem:[%s2502_s30 + $0x40] sm:$0xff] }
 0x117   : > { %v1098_v2 = vmul.f32 0.5, %v1880_v24  ;;  %1151 = vst.msk [vmem:[%s2509_s8 + $0x28] sm:$0xff] %vm1132_vm1, %v1880_v24  ;;  %v736_v9 = vpop.f32.mrf.mxu2 }
 0x118   : > { %1881 = vpow2.f32 %v1066_v61  ;;  %v1017_v37 = vsub.f32 %v975_v62, %v1004_v55  ;;  %v737_v15 = vadd.f32 %v736_v9, %v2453_v0 }
 0x119   : > { %v1111_v20 = vsub.f32 %v1085_v47, %v1098_v2  ;;  %v908_v31 = vpop.f32.mrf.mxu0  ;;  %v834_v32 = vpop.f32.mrf.mxu3 }
 0x11a   : > { %v1034_v54 = vadd.f32 %v2486_v29, %v1017_v37  ;;  %v829_v6 = vadd.f32 %v828_v34, %v737_v15  ;;  %v432_v34 = vpop.xlane.xlu1 %431  ;;  %v435_v2 = vpop.xlane.xlu2 %434 }
 0x11b   : > { %v1124_v52 = vmul.f32 %v1880_v24, %v1111_v20  ;;  %v982_v8 = vpop.f32.mrf.mxu1  ;;  %v1007_v17 = vmul.f32 0.5, %v432_v34 }
 0x11c   : > { %v1048_v63 = vmin.f32 %v1034_v54, %v2488_v38  ;;  %v909_v19 = vadd.f32 %v908_v31, %v829_v6  ;;  %v1008_v6 = vmul.f32 0.5, %v435_v2 }
 0x11d   : > { %1138 = vst.msk [vmem:[%s2516_s11 + $0x28] sm:$0xff] %vm1132_vm1, %v1124_v52 }
 0x11e   : > { %v1882_v46 = vpop.eup %1881  ;;  %v1068_v36 = vmul.f32 1.442695, %v1048_v63  ;;  %v979_v0 = vadd.f32 %v978_v22, %v909_v19  ;;  %v1089_v63 = vld [vmem:[%s2502_s30 + $0x48] sm:$0xff] }
 0x11f   : > { %v1099_v40 = vmul.f32 0.5, %v1882_v46  ;;  %1152 = vst.msk [vmem:[%s2509_s8 + $0x30] sm:$0xff] %vm1132_vm1, %v1882_v46  ;;  %v741_v41 = vpop.f32.mrf.mxu2 }
 0x120   : > { %1883 = vpow2.f32 %v1068_v36  ;;  %v1018_v45 = vsub.f32 %v979_v0, %v1005_v5  ;;  %v742_v21 = vadd.f32 %v741_v41, %v2460_v56  ;;  %v438_v41 = vpop.xlane.xlu0 %437 }
 0x121   : > { %v1112_v49 = vsub.f32 %v1086_v27, %v1099_v40  ;;  %v912_v48 = vpop.f32.mrf.mxu0  ;;  %v840_v7 = vpop.f32.mrf.mxu3 }
 0x122   : > { %v1035_v11 = vadd.f32 %v2486_v29, %v1018_v45  ;;  %v835_v58 = vadd.f32 %v834_v32, %v742_v21 }
 0x123   : > { %v1125_v4 = vmul.f32 %v1882_v46, %v1112_v49  ;;  %v986_v44 = vpop.f32.mrf.mxu1 }
 0x124   : > { %v1049_v25 = vmin.f32 %v1035_v11, %v2488_v38  ;;  %v913_v16 = vadd.f32 %v912_v48, %v835_v58  ;;  %v1009_v58 = vmul.f32 0.5, %v438_v41 }
 0x125   : > { %1139 = vst.msk [vmem:[%s2516_s11 + $0x30] sm:$0xff] %vm1132_vm1, %v1125_v4 }
 0x126   : > { %v1884_v18 = vpop.eup %1883  ;;  %v1070_v33 = vmul.f32 1.442695, %v1049_v25  ;;  %v983_v26 = vadd.f32 %v982_v8, %v913_v16 }
 0x127   : > { %v1100_v56 = vmul.f32 0.5, %v1884_v18  ;;  %1153 = vst.msk [vmem:[%s2509_s8 + $0x38] sm:$0xff] %vm1132_vm1, %v1884_v18  ;;  %v746_v43 = vpop.f32.mrf.mxu2 }
 0x128   : > { %1885 = vpow2.f32 %v1070_v33  ;;  %v1019_v50 = vsub.f32 %v983_v26, %v1006_v35  ;;  %v747_v59 = vadd.f32 %v746_v43, %v2467_v53  ;;  %v1091_v43 = vld [vmem:[%s2502_s30 + $0x58] sm:$0xff] }
 0x129   : > { %v1113_v60 = vsub.f32 %v1087_v23, %v1100_v56  ;;  %v916_v10 = vpop.f32.mrf.mxu0  ;;  %v846_v22 = vpop.f32.mrf.mxu3 }
 0x12a   : > { %v1036_v12 = vadd.f32 %v2486_v29, %v1019_v50  ;;  %v841_v51 = vadd.f32 %v840_v7, %v747_v59  ;;  %v1090_v7 = vld [vmem:[%s2502_s30 + $0x50] sm:$0xff] }
 0x12b   : > { %v1126_v1 = vmul.f32 %v1884_v18, %v1113_v60  ;;  %v990_v15 = vpop.f32.mrf.mxu1 }
 0x12c   : > { %v1050_v28 = vmin.f32 %v1036_v12, %v2488_v38  ;;  %v917_v42 = vadd.f32 %v916_v10, %v841_v51 }
 0x12d   : > { %1140 = vst.msk [vmem:[%s2516_s11 + $0x38] sm:$0xff] %vm1132_vm1, %v1126_v1 }
 0x12e   : > { %v1886_v30 = vpop.eup %1885  ;;  %v1072_v55 = vmul.f32 1.442695, %v1050_v28  ;;  %v987_v24 = vadd.f32 %v986_v44, %v917_v42 }
 0x12f   : > { %v1101_v53 = vmul.f32 0.5, %v1886_v30  ;;  %1154 = vst.msk [vmem:[%s2509_s8 + $0x40] sm:$0xff] %vm1132_vm1, %v1886_v30  ;;  %v751_v47 = vpop.f32.mrf.mxu2 }
 0x130   : > { %1887 = vpow2.f32 %v1072_v55  ;;  %v1020_v61 = vsub.f32 %v987_v24, %v1007_v17  ;;  %v752_v62 = vadd.f32 %v751_v47, %v2473_v3 }
 0x131   : > { %v1114_v9 = vsub.f32 %v1088_v39, %v1101_v53  ;;  %v920_v37 = vpop.f32.mrf.mxu0  ;;  %v852_v46 = vpop.f32.mrf.mxu3 }
 0x132   : > { %v1037_v13 = vadd.f32 %v2486_v29, %v1020_v61  ;;  %v847_v20 = vadd.f32 %v846_v22, %v752_v62 }
 0x133   : > { %v1127_v31 = vmul.f32 %v1886_v30, %v1114_v9  ;;  %v994_v48 = vpop.f32.mrf.mxu1 }
 0x134   : > { %v1051_v32 = vmin.f32 %v1037_v13, %v2488_v38  ;;  %v921_v54 = vadd.f32 %v920_v37, %v847_v20 }
 0x135   : > { %1141 = vst.msk [vmem:[%s2516_s11 + $0x40] sm:$0xff] %vm1132_vm1, %v1127_v31 }
 0x136   : > { %v1888_v52 = vpop.eup %1887  ;;  %v1074_v19 = vmul.f32 1.442695, %v1051_v32  ;;  %v991_v5 = vadd.f32 %v990_v15, %v921_v54 }
 0x137   : > { %v1102_v3 = vmul.f32 0.5, %v1888_v52  ;;  %1155 = vst.msk [vmem:[%s2509_s8 + $0x48] sm:$0xff] %vm1132_vm1, %v1888_v52  ;;  %v756_v8 = vpop.f32.mrf.mxu2 }
 0x138   : > { %1889 = vpow2.f32 %v1074_v19  ;;  %v1021_v27 = vsub.f32 %v991_v5, %v1008_v6  ;;  %v757_v36 = vadd.f32 %v756_v8, %v2479_v14 }
 0x139   : > { %v1115_v0 = vsub.f32 %v1089_v63, %v1102_v3  ;;  %v924_v40 = vpop.f32.mrf.mxu0 }
 0x13a   : > { %v1038_v45 = vadd.f32 %v2486_v29, %v1021_v27  ;;  %v853_v21 = vadd.f32 %v852_v46, %v757_v36 }
 0x13b   : > { %v1128_v49 = vmul.f32 %v1888_v52, %v1115_v0 }
 0x13c   : > { %v1052_v57 = vmin.f32 %v1038_v45, %v2488_v38  ;;  %v925_v11 = vadd.f32 %v924_v40, %v853_v21 }
 0x13d   : > { %1142 = vst.msk [vmem:[%s2516_s11 + $0x48] sm:$0xff] %vm1132_vm1, %v1128_v49 }
 0x13e   : > { %v1890_v4 = vpop.eup %1889  ;;  %v1076_v14 = vmul.f32 1.442695, %v1052_v57  ;;  %v995_v25 = vadd.f32 %v994_v48, %v925_v11 }
 0x13f   : > { %v1103_v16 = vmul.f32 0.5, %v1890_v4  ;;  %1156 = vst.msk [vmem:[%s2509_s8 + $0x50] sm:$0xff] %vm1132_vm1, %v1890_v4 }
 0x140   : > { %1891 = vpow2.f32 %v1076_v14  ;;  %v1022_v35 = vsub.f32 %v995_v25, %v1009_v58 }
 0x141   : > { %v1116_v18 = vsub.f32 %v1090_v7, %v1103_v16 }
 0x142   : > { %v1039_v23 = vadd.f32 %v2486_v29, %v1022_v35  ;;  %v1092_v29 = vld [vmem:[%s2502_s30 + $0x60] sm:$0xff] }
 0x143   : > { %v1129_v33 = vmul.f32 %v1890_v4, %v1116_v18 }
 0x144   : > { %v1053_v26 = vmin.f32 %v1039_v23, %v2488_v38 }
 0x145   : > { %1143 = vst.msk [vmem:[%s2516_s11 + $0x50] sm:$0xff] %vm1132_vm1, %v1129_v33 }
 0x146   : > { %v1892_v56 = vpop.eup %1891  ;;  %v1078_v44 = vmul.f32 1.442695, %v1053_v26 }
 0x147   : > { %v1104_v50 = vmul.f32 0.5, %v1892_v56  ;;  %1157 = vst.msk [vmem:[%s2509_s8 + $0x58] sm:$0xff] %vm1132_vm1, %v1892_v56 }
 0x148   : > { %1893 = vpow2.f32 %v1078_v44 }
 0x149   : > { %v1117_v59 = vsub.f32 %v1091_v43, %v1104_v50 }
 0x14b   : > { %v1130_v60 = vmul.f32 %v1892_v56, %v1117_v59 }
 0x14d   : > { %1144 = vst.msk [vmem:[%s2516_s11 + $0x58] sm:$0xff] %vm1132_vm1, %v1130_v60 }
 0x14e   : > { %v1894_v10 = vpop.eup %1893 }
 0x14f   : > { %v1105_v34 = vmul.f32 0.5, %v1894_v10  ;;  %1158 = vst.msk [vmem:[%s2509_s8 + $0x60] sm:$0xff] %vm1132_vm1, %v1894_v10 }
 0x151   : > { %v1118_v38 = vsub.f32 %v1092_v29, %v1105_v34  ;;  %1169 = sbr.rel (!%p2127_p4) target bundleno = 402 (0x192), region = 48 }
 0x153   : > { %v1131_v12 = vmul.f32 %v1894_v10, %v1118_v38 }
 0x155   : > { %1145 = vst.msk [vmem:[%s2516_s11 + $0x60] sm:$0xff] %vm1132_vm1, %v1131_v12 }
 0x156   : > { %s2811_s12 = smov (!%p1172_p8, %s1171_s12), 13 }
 0x157   : > { %s1686_s18 = sshll.u32 %s2811_s12, 3 }
 0x158   : > { %p1689_p9 = scmp.eq.s32.totalorder %s1686_s18, 0 }
 0x159   : > { %1895 = sdivrem.u32 (!%p1689_p9), %s2811_s12, 13 }
 0x15a   : > { %1180 = sbr.rel (%p1689_p9) target bundleno = 402 (0x192), region = 52 }
 0x162   : > { %s2625_s19 = spop.drf %1895 }
 0x163   : > { %s1897_s20 = spop.drf %1895  ;;  %p1690_p10 = scmp.le.s32.totalorder %s2625_s19, 0 }
 0x164   : > { %s2797_s21 = smov (!%p1690_p10), %s2619_s17  ;;  %s2798_s22 = smov (!%p1690_p10), %s2516_s11 }
 0x165   : > { %1593 = sbr.rel (%p1690_p10) target bundleno = 376 (0x178), region = 203  ;;  %s2634_s23 = smov (!%p1690_p10), 0  }
 0x166   : > { %s2636_s24 = smov (!%p1690_p10), 0  }
 0x16a LB: >> { %v1269_v51 = vld [vmem:[%s2001_s22] sm:$0xff]  ;;  %v1271_v1 = vld [vmem:[%s2001_s22 + $0x8] sm:$0xff]  ;;  %v1273_v28 = vld [vmem:[%s2001_s22 + $0x10] sm:$0xff]  ;;  %s1295_s25 = sadd.s32 1, %s2005_s23  ;;  %s1263_s24 = sadd.s32 1, %s2009_s24   ;;  %s2009_s24 = sphi %s2636_s24, %s1263_s24   ;;  %s2005_s23 = sphi %s2634_s23, %s2801_s23   ;;  %s2001_s22 = sphi %s2798_s22, %s2800_s22   ;;  %s1997_s21 = sphi %s2797_s21, %s2799_s21  }
 0x16b   : >> { %1270 = vst [vmem:[%s1997_s21] sm:$0xff] %v1269_v51  ;;  %v1275_v42 = vld [vmem:[%s2001_s22 + $0x18] sm:$0xff]  ;;  %p1296_p11 = scmp.ge.s32.totalorder %s1295_s25, %s2625_s19  ;;  %v1277_v17 = vld [vmem:[%s2001_s22 + $0x20] sm:$0xff]  ;;  %v1279_v22 = vld [vmem:[%s2001_s22 + $0x28] sm:$0xff]  ;;  %p1262_p12 = scmp.ge.s32.totalorder %s1263_s24, %s2625_s19 }
 0x16c   : >> { %1272 = vst [vmem:[%s1997_s21 + $0x8] sm:$0xff] %v1271_v1  ;;  %v1281_v30 = vld [vmem:[%s2001_s22 + $0x30] sm:$0xff]  ;;  %v1283_v39 = vld [vmem:[%s2001_s22 + $0x38] sm:$0xff]  ;;  %v1285_v55 = vld [vmem:[%s2001_s22 + $0x40] sm:$0xff] }
 0x16d   : >> { %1274 = vst [vmem:[%s1997_s21 + $0x10] sm:$0xff] %v1273_v28  ;;  %s2813_s25 = smov (%p1296_p11, %s1295_s25), 0  ;;  %v1287_v24 = vld [vmem:[%s2001_s22 + $0x48] sm:$0xff]  ;;  %v1289_v53 = vld [vmem:[%s2001_s22 + $0x50] sm:$0xff]  ;;  %v1291_v47 = vld [vmem:[%s2001_s22 + $0x58] sm:$0xff] }
 0x16e   : >> { %1276 = vst [vmem:[%s1997_s21 + $0x18] sm:$0xff] %v1275_v42  ;;  %s1298_s26 = smul.u32 104, %s2813_s25  ;;  %v1293_v61 = vld [vmem:[%s2001_s22 + $0x60] sm:$0xff]  ;;  %s2801_s23 = smov %s2813_s25 }
 0x16f   : >> { %1278 = vst [vmem:[%s1997_s21 + $0x20] sm:$0xff] %v1277_v17 }
 0x170   : >> { %1280 = vst [vmem:[%s1997_s21 + $0x28] sm:$0xff] %v1279_v22  ;;  %s1300_s28 = scalar_lea.vmem %s2516_s11, %s1298_s26 [#allocation3]   ;;  %s1301_s30 = scalar_lea.vmem %s2619_s17, %s1298_s26  }
 0x171   : >> { %1282 = vst [vmem:[%s1997_s21 + $0x30] sm:$0xff] %v1281_v30  ;;  %s2800_s22 = smov %s1300_s28 }
 0x172   : >> { %1284 = vst [vmem:[%s1997_s21 + $0x38] sm:$0xff] %v1283_v39 }
 0x173   : >> { %1286 = vst [vmem:[%s1997_s21 + $0x40] sm:$0xff] %v1285_v55  ;;  %1265 = sbr.rel (!%p1262_p12) target bundleno = 362 (0x16a), region = 209 }
 0x174   : >> { %1288 = vst [vmem:[%s1997_s21 + $0x48] sm:$0xff] %v1287_v24 }
 0x175   : >> { %1290 = vst [vmem:[%s1997_s21 + $0x50] sm:$0xff] %v1289_v53 }
 0x176   : >> { %1292 = vst [vmem:[%s1997_s21 + $0x58] sm:$0xff] %v1291_v47 }
 0x177   : >> { %1294 = vst [vmem:[%s1997_s21 + $0x60] sm:$0xff] %v1293_v61  ;;  %s2799_s21 = smov %s1301_s30 }
 0x178 PF: > { %1898 = sdivrem.u32 %s2811_s12, 13 }
 0x179   : > { %s1691_s14 = smul.u32 104, %s2625_s19 }
 0x17b   : > { %s2690_s15 = scalar_lea.vmem %s2516_s11, %s1691_s14 [#allocation3]   ;;  %s1308_s16 = scalar_lea.vmem %s2619_s17, %s1691_s14  }
 0x181   : > { %s1899_s18 = spop.drf %1898 }
 0x182   : > { %s1900_s20 = spop.drf %1898 }
 0x183   : > { %p1693_p13 = scmp.le.s32.totalorder %s1900_s20, 0 }
 0x184   : > { %s2011_s26 = smov (!%p1693_p13), %s1308_s16   ;;  %s2015_s25 = smov (!%p1693_p13), %s2690_s15  }
 0x185   : > { %1607 = sbr.rel (%p1693_p13) target bundleno = 402 (0x192), region = 214  ;;  %s2019_s28 = smov (!%p1693_p13), 0  }
 0x186   : > { %s2023_s24 = smov (!%p1693_p13), 0  }
 0x18a LB: >> { %v1318_v62 = vld [vmem:[%s2017_s25] sm:$0xff]  ;;  %s1320_s11 = sadd.s32 1, %s2021_s28  ;;  %s1312_s24 = sadd.s32 1, %s2025_s24   ;;  %s2025_s24 = sphi %s2023_s24, %s1312_s24   ;;  %s2021_s28 = sphi %s2019_s28, %s2020_s28   ;;  %s2017_s25 = sphi %s2015_s25, %s1325_s25   ;;  %s2013_s26 = sphi %s2011_s26, %s1326_s26  }
 0x18b   : >> { %1319 = vst [vmem:[%s2013_s26] sm:$0xff] %v1318_v62  ;;  %p1321_p0 = scmp.ge.s32.totalorder %s1320_s11, %s1900_s20  ;;  %p1311_p1 = scmp.ge.s32.totalorder %s1312_s24, %s1900_s20 }
 0x18d   : >> { %s2815_s11 = smov (%p1321_p0, %s1320_s11), 0  ;;  %1314 = sbr.rel (!%p1311_p1) target bundleno = 394 (0x18a), region = 220 }
 0x18e   : >> { %s1694_s12 = sshll.u32 %s2815_s11, 3  ;;  %s2020_s28 = smov %s2815_s11  }
 0x18f   : >> { %s1325_s25 = scalar_lea.vmem %s2690_s15, %s1694_s12 [#allocation3]   ;;  %s1326_s26 = scalar_lea.vmem %s1308_s16, %s1694_s12  }
 0x192 PF: > { %1332 = sbr.rel (!%p2127_p4) target bundleno = 467 (0x1d3), region = 100  ;;  %s1334_s17 = ssub.s32 (%p2127_p4), 25, %s2135_s13 }
 0x193   : > { %s1709_s19 = smul.u32 (%p2127_p4), 104, %s2115_s5  ;;  %p1335_p2 = scmp.lt.s32.totalorder (%p2127_p4), %s1334_s17, 13 }
 0x195   : > { %s2702_s23 = scalar_lea.vmem (%p2127_p4), %s2795_s7, %s1709_s19  }
 0x197   : > { %s2817_s17 = smov (!%p1335_p2, %s1334_s17), 13 }
 0x198   : > { %s1696_s30 = sshll.u32 %s2817_s17, 3 }
 0x199   : > { %p1699_p3 = scmp.eq.s32.totalorder %s1696_s30, 0 }
 0x19a   : > { %1901 = sdivrem.u32 (!%p1699_p3), %s2817_s17, 13 }
 0x19b   : > { %1343 = sbr.rel (%p1699_p3) target bundleno = 467 (0x1d3), region = 104 }
 0x1a3   : > { %s2708_s10 = spop.drf %1901 }
 0x1a4   : > { %s1903_s14 = spop.drf %1901  ;;  %p1700_p4 = scmp.le.s32.totalorder %s2708_s10, 0 }
 0x1a5   : > { %s2802_s5 = smov (!%p1700_p4), %s2702_s23  ;;  %s2803_s13 = smov (!%p1700_p4), %s2509_s8 }
 0x1a6   : > { %1621 = sbr.rel (%p1700_p4) target bundleno = 441 (0x1b9), region = 225  ;;  %s2717_s15 = smov (!%p1700_p4), 0  }
 0x1a7   : > { %s2719_s16 = smov (!%p1700_p4), 0  }
 0x1ab LB: >> { %v1432_v2 = vld [vmem:[%s2033_s13] sm:$0xff]  ;;  %v1434_v9 = vld [vmem:[%s2033_s13 + $0x8] sm:$0xff]  ;;  %v1436_v37 = vld [vmem:[%s2033_s13 + $0x10] sm:$0xff]  ;;  %s1458_s18 = sadd.s32 1, %s2037_s15  ;;  %s1426_s16 = sadd.s32 1, %s2041_s16   ;;  %s2041_s16 = sphi %s2719_s16, %s1426_s16   ;;  %s2037_s15 = sphi %s2717_s15, %s2806_s15   ;;  %s2033_s13 = sphi %s2803_s13, %s2805_s13   ;;  %s2029_s5 = sphi %s2802_s5, %s2804_s5  }
 0x1ac   : >> { %1433 = vst [vmem:[%s2029_s5] sm:$0xff] %v1432_v2  ;;  %v1438_v15 = vld [vmem:[%s2033_s13 + $0x18] sm:$0xff]  ;;  %p1459_p5 = scmp.ge.s32.totalorder %s1458_s18, %s2708_s10  ;;  %v1440_v13 = vld [vmem:[%s2033_s13 + $0x20] sm:$0xff]  ;;  %v1442_v20 = vld [vmem:[%s2033_s13 + $0x28] sm:$0xff]  ;;  %p1425_p6 = scmp.ge.s32.totalorder %s1426_s16, %s2708_s10 }
 0x1ad   : >> { %1435 = vst [vmem:[%s2029_s5 + $0x8] sm:$0xff] %v1434_v9  ;;  %v1444_v31 = vld [vmem:[%s2033_s13 + $0x30] sm:$0xff]  ;;  %v1446_v32 = vld [vmem:[%s2033_s13 + $0x38] sm:$0xff]  ;;  %v1448_v54 = vld [vmem:[%s2033_s13 + $0x40] sm:$0xff] }
 0x1ae   : >> { %1437 = vst [vmem:[%s2029_s5 + $0x10] sm:$0xff] %v1436_v37  ;;  %s2819_s18 = smov (%p1459_p5, %s1458_s18), 0  ;;  %v1450_v6 = vld [vmem:[%s2033_s13 + $0x48] sm:$0xff]  ;;  %v1452_v52 = vld [vmem:[%s2033_s13 + $0x50] sm:$0xff]  ;;  %v1454_v63 = vld [vmem:[%s2033_s13 + $0x58] sm:$0xff] }
 0x1af   : >> { %1439 = vst [vmem:[%s2029_s5 + $0x18] sm:$0xff] %v1438_v15  ;;  %s1461_s20 = smul.u32 104, %s2819_s18  ;;  %v1456_v19 = vld [vmem:[%s2033_s13 + $0x60] sm:$0xff]  ;;  %s2806_s15 = smov %s2819_s18 }
 0x1b0   : >> { %1441 = vst [vmem:[%s2029_s5 + $0x20] sm:$0xff] %v1440_v13 }
 0x1b1   : >> { %1443 = vst [vmem:[%s2029_s5 + $0x28] sm:$0xff] %v1442_v20  ;;  %s1463_s26 = scalar_lea.vmem %s2509_s8, %s1461_s20 [#allocation4]   ;;  %s1464_s25 = scalar_lea.vmem %s2702_s23, %s1461_s20  }
 0x1b2   : >> { %1445 = vst [vmem:[%s2029_s5 + $0x30] sm:$0xff] %v1444_v31  ;;  %s2805_s13 = smov %s1463_s26 }
 0x1b3   : >> { %1447 = vst [vmem:[%s2029_s5 + $0x38] sm:$0xff] %v1446_v32 }
 0x1b4   : >> { %1449 = vst [vmem:[%s2029_s5 + $0x40] sm:$0xff] %v1448_v54  ;;  %1428 = sbr.rel (!%p1425_p6) target bundleno = 427 (0x1ab), region = 231 }
 0x1b5   : >> { %1451 = vst [vmem:[%s2029_s5 + $0x48] sm:$0xff] %v1450_v6 }
 0x1b6   : >> { %1453 = vst [vmem:[%s2029_s5 + $0x50] sm:$0xff] %v1452_v52 }
 0x1b7   : >> { %1455 = vst [vmem:[%s2029_s5 + $0x58] sm:$0xff] %v1454_v63 }
 0x1b8   : >> { %1457 = vst [vmem:[%s2029_s5 + $0x60] sm:$0xff] %v1456_v19  ;;  %s2804_s5 = smov %s1464_s25 }
 0x1b9 PF: > { %1904 = sdivrem.u32 %s2817_s17, 13 }
 0x1ba   : > { %s1701_s28 = smul.u32 104, %s2708_s10 }
 0x1bc   : > { %s2773_s24 = scalar_lea.vmem %s2509_s8, %s1701_s28 [#allocation4]   ;;  %s1471_s11 = scalar_lea.vmem %s2702_s23, %s1701_s28  }
 0x1c2   : > { %s1905_s12 = spop.drf %1904 }
 0x1c3   : > { %s1906_s19 = spop.drf %1904 }
 0x1c4   : > { %p1703_p7 = scmp.le.s32.totalorder %s1906_s19, 0 }
 0x1c5   : > { %s2043_s21 = smov (!%p1703_p7), %s1471_s11   ;;  %s2047_s22 = smov (!%p1703_p7), %s2773_s24  }
 0x1c6   : > { %1635 = sbr.rel (%p1703_p7) target bundleno = 467 (0x1d3), region = 236  ;;  %s2051_s30 = smov (!%p1703_p7), 0  }
 0x1c7   : > { %s2055_s14 = smov (!%p1703_p7), 0  }
 0x1cb LB: >> { %v1481_v5 = vld [vmem:[%s2049_s22] sm:$0xff]  ;;  %s1483_s8 = sadd.s32 1, %s2053_s30  ;;  %s1475_s14 = sadd.s32 1, %s2057_s14   ;;  %s2057_s14 = sphi %s2055_s14, %s1475_s14   ;;  %s2053_s30 = sphi %s2051_s30, %s2052_s30   ;;  %s2049_s22 = sphi %s2047_s22, %s1488_s22   ;;  %s2045_s21 = sphi %s2043_s21, %s1489_s21  }
 0x1cc   : >> { %1482 = vst [vmem:[%s2045_s21] sm:$0xff] %v1481_v5  ;;  %p1484_p8 = scmp.ge.s32.totalorder %s1483_s8, %s1906_s19  ;;  %p1474_p9 = scmp.ge.s32.totalorder %s1475_s14, %s1906_s19 }
 0x1ce   : >> { %s2821_s8 = smov (%p1484_p8, %s1483_s8), 0  ;;  %1477 = sbr.rel (!%p1474_p9) target bundleno = 459 (0x1cb), region = 242 }
 0x1cf   : >> { %s1704_s17 = sshll.u32 %s2821_s8, 3  ;;  %s2052_s30 = smov %s2821_s8  }
 0x1d0   : >> { %s1488_s22 = scalar_lea.vmem %s2773_s24, %s1704_s17 [#allocation4]   ;;  %s1489_s21 = scalar_lea.vmem %s1471_s11, %s1704_s17  }
 0x1d3 PF: > { %p16_p10 = scmp.ge.s32.totalorder %s2117_s29, 4   ;;  %s2807_s26 = smov %s1989_s27 }
 0x1d4   : > { %s2808_s27 = smov %s2125_s9  ;;  %s2809_s28 = smov %s2117_s29 }
 0x1d5   :  { %18 = sbr.rel (!%p16_p10) target bundleno = 4 (0x4), region = 253 }

</bundles_post_ra>
